<compile_context>
chip_gen: v5e
topology: v5e:2x2
jax: 0.10.0
libtpu: 0.0.40
codegen_flags: <defaults>
</compile_context>

<pallas_src>
from functools import partial

import jax
import jax.numpy as jnp
from jax.experimental import pallas as pl
from jax.experimental.pallas import tpu as pltpu


def _attention_kernel(x_ref, wqkv_ref, wproj_ref, bias_ref, o_ref, *, num_heads):
    # x_ref: (N, C) f32 block for the current batch element (leading dim squeezed)
    N, C = x_ref.shape
    hd = C // num_heads

    x = x_ref[...].astype(jnp.bfloat16)                                   # one cast per row
    # QKV projection; the q scale is already folded into wqkv's Q columns.
    qkv = jnp.dot(x, wqkv_ref[...], preferred_element_type=jnp.float32)   # (N, 3C) f32

    # Accumulate the projected output starting from the bias (hoisted broadcast).
    y = jnp.broadcast_to(bias_ref[...], (N, C)).astype(jnp.float32)       # (N, C) f32

    for h in range(num_heads):                                            # static unroll
        q = qkv[:,         h * hd:(h + 1) * hd].astype(jnp.bfloat16)      # (N, hd), pre-scaled
        k = qkv[:, C +     h * hd:C + (h + 1) * hd].astype(jnp.bfloat16)
        v = qkv[:, 2 * C + h * hd:2 * C + (h + 1) * hd].astype(jnp.bfloat16)

        # q @ k^T without materializing a transpose: contract the last dims.
        s = jnp.einsum("qd,kd->qk", q, k,
                       preferred_element_type=jnp.float32)                # (N, N) f32

        m = jnp.max(s, axis=-1, keepdims=True)                            # stable softmax, f32
        p = jnp.exp(s - m)
        l = jnp.sum(p, axis=-1, keepdims=True)
        inv_l = pl.reciprocal(l, approx=True)                             # EUP slot, frees VALU

        # Unnormalized P @ V (bf16 operands, f32 accum); fold 1/l into the
        # small (N, hd) head output rather than the (N, N) probability tile.
        o_h = jnp.dot(p.astype(jnp.bfloat16), v,
                      preferred_element_type=jnp.float32) * inv_l         # (N, hd) f32

        # Fused output projection: accumulate this head's contribution into a
        # lane-dense (N, C) accumulator (no concatenate / relayout).
        y = y + jnp.dot(o_h.astype(jnp.bfloat16), wproj_ref[h],
                        preferred_element_type=jnp.float32)               # (N, C) f32

    o_ref[...] = y.astype(o_ref.dtype)


def attention_forward(x, w_qkv, w_proj, b_proj, *, num_heads):
    """Attention forward.

    x:      (B, N, C) activations.
    w_qkv:  (3C, C)  — nn.Linear(dim, 3*dim, bias=False).weight (PyTorch layout).
    w_proj: (C, C)   — nn.Linear(dim, dim, bias=True).weight   (PyTorch layout).
    b_proj: (C,)     — nn.Linear(dim, dim, bias=True).bias.
    """
    B, N, C = x.shape
    assert C % num_heads == 0
    hd = C // num_heads
    scale = hd ** (-0.5)

    # Host-side prep: transpose to (in, out), fold the q scale into the Q
    # columns, pre-cast MXU operands to bf16, reshape the proj weight per head.
    col_scale = jnp.where(jnp.arange(3 * C) < C, scale, 1.0).astype(jnp.float32)
    wqkv_t = (jnp.transpose(w_qkv) * col_scale[None, :]).astype(jnp.bfloat16)   # (C, 3C)
    wproj_h = jnp.transpose(w_proj).reshape(num_heads, hd, C).astype(jnp.bfloat16)
    bias = b_proj.reshape(1, C).astype(jnp.float32)

    kernel = partial(_attention_kernel, num_heads=num_heads)

    return pl.pallas_call(
        kernel,
        out_shape=jax.ShapeDtypeStruct((B, N, C), x.dtype),
        grid_spec=pltpu.PrefetchScalarGridSpec(
            num_scalar_prefetch=0,
            grid=(B,),
            in_specs=[
                pl.BlockSpec((None, N, C), lambda b: (b, 0, 0)),        # x row (squeezed)
                pl.BlockSpec((C, 3 * C), lambda b: (0, 0)),             # qkv weight (bf16)
                pl.BlockSpec((num_heads, hd, C), lambda b: (0, 0, 0)),  # per-head proj weight
                pl.BlockSpec((1, C), lambda b: (0, 0)),                 # proj bias
            ],
            out_specs=pl.BlockSpec((None, N, C), lambda b: (b, 0, 0)),
        ),
        compiler_params=pltpu.CompilerParams(
            dimension_semantics=("parallel",),
            vmem_limit_bytes=32 * 1024 * 1024,
        ),
    )(x, wqkv_t, wproj_h, bias)


def attention_reference(x, w_qkv, w_proj, b_proj, *, num_heads):
    """Pure-JAX reference of the PyTorch forward, mirroring the kernel's
    bf16-operand / f32-accumulate MXU precision so the comparison stays tight."""
    B, N, C = x.shape
    hd = C // num_heads
    scale = hd ** (-0.5)
    bf, f32 = jnp.bfloat16, jnp.float32

    wqkv_t = (jnp.transpose(w_qkv) *
              jnp.where(jnp.arange(3 * C) < C, scale, 1.0)[None, :]).astype(bf)
    qkv = jnp.einsum("bnc,cd->bnd", x.astype(bf), wqkv_t,
                     preferred_element_type=f32)                          # (B, N, 3C)
    qkv = qkv.reshape(B, N, 3, num_heads, hd).transpose(2, 0, 3, 1, 4)
    q, k, v = qkv[0].astype(bf), qkv[1].astype(bf), qkv[2].astype(bf)     # (B, H, N, hd)
    s = jnp.einsum("bhqd,bhkd->bhqk", q, k, preferred_element_type=f32)
    p = jax.nn.softmax(s, axis=-1)
    o = jnp.einsum("bhqk,bhkd->bhqd", p.astype(bf), v, preferred_element_type=f32)
    o = o.transpose(0, 2, 1, 3).reshape(B, N, C)
    y = jnp.einsum("bnc,cd->bnd", o.astype(bf), jnp.transpose(w_proj).astype(bf),
                   preferred_element_type=f32)
    return y + b_proj[None, None, :]


if __name__ == "__main__":
    B, N, C, num_heads = 2, 8, 32, 8

    key = jax.random.PRNGKey(0)
    k_x, k_qkv, k_proj, k_bias = jax.random.split(key, 4)

    x = jax.random.normal(k_x, (B, N, C), dtype=jnp.float32)
    # nn.Linear(dim, 3*dim, bias=False): weight (3C, C)
    w_qkv = jax.random.normal(k_qkv, (3 * C, C), dtype=jnp.float32) * (1.0 / jnp.sqrt(C))
    # nn.Linear(dim, dim, bias=True): weight (C, C), bias (C,)
    w_proj = jax.random.normal(k_proj, (C, C), dtype=jnp.float32) * (1.0 / jnp.sqrt(C))
    b_proj = jax.random.normal(k_bias, (C,), dtype=jnp.float32) * 0.1

    out = jax.block_until_ready(
        attention_forward(x, w_qkv, w_proj, b_proj, num_heads=num_heads))
    ref = jax.block_until_ready(
        attention_reference(x, w_qkv, w_proj, b_proj, num_heads=num_heads))

    assert out.shape == (B, N, C)
    # Kernel uses bf16 MXU operands (f32 accumulation) + approx reciprocal, so
    # compare against the precision-mirrored reference.
    max_diff = float(jnp.max(jnp.abs(out - ref)))
    assert jnp.allclose(out, ref, atol=3e-2, rtol=3e-2), (
        f"mismatch vs reference: max |diff| = {max_diff}")

    print("KERNEL_OK")
</pallas_src>

<mosaic_0001>
module attributes {stable_mosaic.version = 11 : i64} {
  func.func @_attention_kernel(%arg0: i32, %arg1: memref<1x8x32xf32, #tpu.memory_space<vmem>>, %arg2: memref<32x96xbf16, #tpu.memory_space<vmem>>, %arg3: memref<8x4x32xbf16, #tpu.memory_space<vmem>>, %arg4: memref<1x32xf32, #tpu.memory_space<vmem>>, %arg5: memref<1x8x32xf32, #tpu.memory_space<vmem>>) attributes {dimension_semantics = [#tpu.dimension_semantics<parallel>], iteration_bounds = array<i64: 2>, scalar_prefetch = 0 : i64, scratch_operands = 0 : i64, tpu.core_type = #tpu.core_type<tc>, window_params = [{transform_indices = @transform_0, window_bounds = array<i64: 1, 8, 32>}, {pipeline_mode = #tpu.pipeline_mode<synchronous>, transform_indices = @transform_1, window_bounds = array<i64: 32, 96>}, {pipeline_mode = #tpu.pipeline_mode<synchronous>, transform_indices = @transform_2, window_bounds = array<i64: 8, 4, 32>}, {pipeline_mode = #tpu.pipeline_mode<synchronous>, transform_indices = @transform_3, window_bounds = array<i64: 1, 32>}, {transform_indices = @transform_4, window_bounds = array<i64: 1, 8, 32>}]} {
    %c0 = arith.constant 0 : index
    %c0_0 = arith.constant 0 : index
    %c0_1 = arith.constant 0 : index
    %0 = vector.load %arg1[%c0, %c0_0, %c0_1] : memref<1x8x32xf32, #tpu.memory_space<vmem>>, vector<1x8x32xf32>
    %1 = vector.shape_cast %0 : vector<1x8x32xf32> to vector<8x32xf32>
    %2 = arith.truncf %1 : vector<8x32xf32> to vector<8x32xbf16>
    %c0_2 = arith.constant 0 : index
    %c0_3 = arith.constant 0 : index
    %3 = vector.load %arg2[%c0_2, %c0_3] : memref<32x96xbf16, #tpu.memory_space<vmem>>, vector<32x96xbf16>
    %cst = arith.constant dense<0.000000e+00> : vector<8x96xf32>
    %4 = tpu.matmul %2, %3, %cst {dimension_numbers = #tpu.dot_dimension_numbers<[1], [0], [0], [1], [0, 0, 1, 1], [], []>} : vector<8x32xbf16>, vector<32x96xbf16>, vector<8x96xf32> -> vector<8x96xf32>
    %c0_4 = arith.constant 0 : index
    %c0_5 = arith.constant 0 : index
    %5 = vector.load %arg4[%c0_4, %c0_5] : memref<1x32xf32, #tpu.memory_space<vmem>>, vector<1x32xf32>
    %6 = vector.shape_cast %5 : vector<1x32xf32> to vector<1x32xf32>
    %7 = vector.broadcast %6 : vector<1x32xf32> to vector<8x32xf32>
    %8 = vector.extract_strided_slice %4 {offsets = [0, 0], sizes = [8, 4], strides = [1, 1]} : vector<8x96xf32> to vector<8x4xf32>
    %9 = arith.truncf %8 : vector<8x4xf32> to vector<8x4xbf16>
    %10 = vector.extract_strided_slice %4 {offsets = [0, 32], sizes = [8, 4], strides = [1, 1]} : vector<8x96xf32> to vector<8x4xf32>
    %11 = arith.truncf %10 : vector<8x4xf32> to vector<8x4xbf16>
    %12 = vector.extract_strided_slice %4 {offsets = [0, 64], sizes = [8, 4], strides = [1, 1]} : vector<8x96xf32> to vector<8x4xf32>
    %13 = arith.truncf %12 : vector<8x4xf32> to vector<8x4xbf16>
    "tpu.trace_start"() <{level = 10 : i32, message = "qd,kd->qk"}> : () -> ()
    %cst_6 = arith.constant dense<0.000000e+00> : vector<8x8xf32>
    %14 = tpu.matmul %9, %11, %cst_6 {dimension_numbers = #tpu.dot_dimension_numbers<[1], [1], [0], [0], [0, 0, 1, 0], [], []>} : vector<8x4xbf16>, vector<8x4xbf16>, vector<8x8xf32> -> vector<8x8xf32>
    "tpu.trace_stop"() : () -> ()
    %cst_7 = arith.constant dense<0xFF800000> : vector<8xf32>
    %15 = vector.multi_reduction <maximumf>, %14, %cst_7 [1] : vector<8x8xf32> to vector<8xf32>
    %16 = vector.shape_cast %15 : vector<8xf32> to vector<8x1xf32>
    %17 = vector.broadcast %16 : vector<8x1xf32> to vector<8x8xf32>
    %18 = arith.subf %14, %17 : vector<8x8xf32>
    %19 = math.exp %18 : vector<8x8xf32>
    %cst_8 = arith.constant dense<0.000000e+00> : vector<8xf32>
    %20 = vector.multi_reduction <add>, %19, %cst_8 [1] : vector<8x8xf32> to vector<8xf32>
    %21 = vector.shape_cast %20 : vector<8xf32> to vector<8x1xf32>
    %22 = tpu.reciprocal %21 {approx = true} : vector<8x1xf32> -> vector<8x1xf32>
    %23 = arith.truncf %19 : vector<8x8xf32> to vector<8x8xbf16>
    %cst_9 = arith.constant dense<0.000000e+00> : vector<8x4xf32>
    %24 = tpu.matmul %23, %13, %cst_9 {dimension_numbers = #tpu.dot_dimension_numbers<[1], [0], [0], [1], [0, 0, 1, 1], [], []>} : vector<8x8xbf16>, vector<8x4xbf16>, vector<8x4xf32> -> vector<8x4xf32>
    %25 = vector.broadcast %22 : vector<8x1xf32> to vector<8x4xf32>
    %26 = arith.mulf %24, %25 : vector<8x4xf32>
    %27 = arith.truncf %26 : vector<8x4xf32> to vector<8x4xbf16>
    %c0_10 = arith.constant 0 : index
    %c0_11 = arith.constant 0 : index
    %c0_12 = arith.constant 0 : index
    %28 = vector.load %arg3[%c0_10, %c0_11, %c0_12] : memref<8x4x32xbf16, #tpu.memory_space<vmem>>, vector<1x4x32xbf16>
    %29 = vector.shape_cast %28 : vector<1x4x32xbf16> to vector<4x32xbf16>
    %cst_13 = arith.constant dense<0.000000e+00> : vector<8x32xf32>
    %30 = tpu.matmul %27, %29, %cst_13 {dimension_numbers = #tpu.dot_dimension_numbers<[1], [0], [0], [1], [0, 0, 1, 1], [], []>} : vector<8x4xbf16>, vector<4x32xbf16>, vector<8x32xf32> -> vector<8x32xf32>
    %31 = arith.addf %7, %30 : vector<8x32xf32>
    %32 = vector.extract_strided_slice %4 {offsets = [0, 4], sizes = [8, 4], strides = [1, 1]} : vector<8x96xf32> to vector<8x4xf32>
    %33 = arith.truncf %32 : vector<8x4xf32> to vector<8x4xbf16>
    %34 = vector.extract_strided_slice %4 {offsets = [0, 36], sizes = [8, 4], strides = [1, 1]} : vector<8x96xf32> to vector<8x4xf32>
    %35 = arith.truncf %34 : vector<8x4xf32> to vector<8x4xbf16>
    %36 = vector.extract_strided_slice %4 {offsets = [0, 68], sizes = [8, 4], strides = [1, 1]} : vector<8x96xf32> to vector<8x4xf32>
    %37 = arith.truncf %36 : vector<8x4xf32> to vector<8x4xbf16>
    "tpu.trace_start"() <{level = 10 : i32, message = "qd,kd->qk"}> : () -> ()
    %cst_14 = arith.constant dense<0.000000e+00> : vector<8x8xf32>
    %38 = tpu.matmul %33, %35, %cst_14 {dimension_numbers = #tpu.dot_dimension_numbers<[1], [1], [0], [0], [0, 0, 1, 0], [], []>} : vector<8x4xbf16>, vector<8x4xbf16>, vector<8x8xf32> -> vector<8x8xf32>
    "tpu.trace_stop"() : () -> ()
    %cst_15 = arith.constant dense<0xFF800000> : vector<8xf32>
    %39 = vector.multi_reduction <maximumf>, %38, %cst_15 [1] : vector<8x8xf32> to vector<8xf32>
    %40 = vector.shape_cast %39 : vector<8xf32> to vector<8x1xf32>
    %41 = vector.broadcast %40 : vector<8x1xf32> to vector<8x8xf32>
    %42 = arith.subf %38, %41 : vector<8x8xf32>
    %43 = math.exp %42 : vector<8x8xf32>
    %cst_16 = arith.constant dense<0.000000e+00> : vector<8xf32>
    %44 = vector.multi_reduction <add>, %43, %cst_16 [1] : vector<8x8xf32> to vector<8xf32>
    %45 = vector.shape_cast %44 : vector<8xf32> to vector<8x1xf32>
    %46 = tpu.reciprocal %45 {approx = true} : vector<8x1xf32> -> vector<8x1xf32>
    %47 = arith.truncf %43 : vector<8x8xf32> to vector<8x8xbf16>
    %cst_17 = arith.constant dense<0.000000e+00> : vector<8x4xf32>
    %48 = tpu.matmul %47, %37, %cst_17 {dimension_numbers = #tpu.dot_dimension_numbers<[1], [0], [0], [1], [0, 0, 1, 1], [], []>} : vector<8x8xbf16>, vector<8x4xbf16>, vector<8x4xf32> -> vector<8x4xf32>
    %49 = vector.broadcast %46 : vector<8x1xf32> to vector<8x4xf32>
    %50 = arith.mulf %48, %49 : vector<8x4xf32>
    %51 = arith.truncf %50 : vector<8x4xf32> to vector<8x4xbf16>
    %c1 = arith.constant 1 : index
    %c0_18 = arith.constant 0 : index
    %c0_19 = arith.constant 0 : index
    %52 = vector.load %arg3[%c1, %c0_18, %c0_19] : memref<8x4x32xbf16, #tpu.memory_space<vmem>>, vector<1x4x32xbf16>
    %53 = vector.shape_cast %52 : vector<1x4x32xbf16> to vector<4x32xbf16>
    %cst_20 = arith.constant dense<0.000000e+00> : vector<8x32xf32>
    %54 = tpu.matmul %51, %53, %cst_20 {dimension_numbers = #tpu.dot_dimension_numbers<[1], [0], [0], [1], [0, 0, 1, 1], [], []>} : vector<8x4xbf16>, vector<4x32xbf16>, vector<8x32xf32> -> vector<8x32xf32>
    %55 = arith.addf %31, %54 : vector<8x32xf32>
    %56 = vector.extract_strided_slice %4 {offsets = [0, 8], sizes = [8, 4], strides = [1, 1]} : vector<8x96xf32> to vector<8x4xf32>
    %57 = arith.truncf %56 : vector<8x4xf32> to vector<8x4xbf16>
    %58 = vector.extract_strided_slice %4 {offsets = [0, 40], sizes = [8, 4], strides = [1, 1]} : vector<8x96xf32> to vector<8x4xf32>
    %59 = arith.truncf %58 : vector<8x4xf32> to vector<8x4xbf16>
    %60 = vector.extract_strided_slice %4 {offsets = [0, 72], sizes = [8, 4], strides = [1, 1]} : vector<8x96xf32> to vector<8x4xf32>
    %61 = arith.truncf %60 : vector<8x4xf32> to vector<8x4xbf16>
    "tpu.trace_start"() <{level = 10 : i32, message = "qd,kd->qk"}> : () -> ()
    %cst_21 = arith.constant dense<0.000000e+00> : vector<8x8xf32>
    %62 = tpu.matmul %57, %59, %cst_21 {dimension_numbers = #tpu.dot_dimension_numbers<[1], [1], [0], [0], [0, 0, 1, 0], [], []>} : vector<8x4xbf16>, vector<8x4xbf16>, vector<8x8xf32> -> vector<8x8xf32>
    "tpu.trace_stop"() : () -> ()
    %cst_22 = arith.constant dense<0xFF800000> : vector<8xf32>
    %63 = vector.multi_reduction <maximumf>, %62, %cst_22 [1] : vector<8x8xf32> to vector<8xf32>
    %64 = vector.shape_cast %63 : vector<8xf32> to vector<8x1xf32>
    %65 = vector.broadcast %64 : vector<8x1xf32> to vector<8x8xf32>
    %66 = arith.subf %62, %65 : vector<8x8xf32>
    %67 = math.exp %66 : vector<8x8xf32>
    %cst_23 = arith.constant dense<0.000000e+00> : vector<8xf32>
    %68 = vector.multi_reduction <add>, %67, %cst_23 [1] : vector<8x8xf32> to vector<8xf32>
    %69 = vector.shape_cast %68 : vector<8xf32> to vector<8x1xf32>
    %70 = tpu.reciprocal %69 {approx = true} : vector<8x1xf32> -> vector<8x1xf32>
    %71 = arith.truncf %67 : vector<8x8xf32> to vector<8x8xbf16>
    %cst_24 = arith.constant dense<0.000000e+00> : vector<8x4xf32>
    %72 = tpu.matmul %71, %61, %cst_24 {dimension_numbers = #tpu.dot_dimension_numbers<[1], [0], [0], [1], [0, 0, 1, 1], [], []>} : vector<8x8xbf16>, vector<8x4xbf16>, vector<8x4xf32> -> vector<8x4xf32>
    %73 = vector.broadcast %70 : vector<8x1xf32> to vector<8x4xf32>
    %74 = arith.mulf %72, %73 : vector<8x4xf32>
    %75 = arith.truncf %74 : vector<8x4xf32> to vector<8x4xbf16>
    %c2 = arith.constant 2 : index
    %c0_25 = arith.constant 0 : index
    %c0_26 = arith.constant 0 : index
    %76 = vector.load %arg3[%c2, %c0_25, %c0_26] : memref<8x4x32xbf16, #tpu.memory_space<vmem>>, vector<1x4x32xbf16>
    %77 = vector.shape_cast %76 : vector<1x4x32xbf16> to vector<4x32xbf16>
    %cst_27 = arith.constant dense<0.000000e+00> : vector<8x32xf32>
    %78 = tpu.matmul %75, %77, %cst_27 {dimension_numbers = #tpu.dot_dimension_numbers<[1], [0], [0], [1], [0, 0, 1, 1], [], []>} : vector<8x4xbf16>, vector<4x32xbf16>, vector<8x32xf32> -> vector<8x32xf32>
    %79 = arith.addf %55, %78 : vector<8x32xf32>
    %80 = vector.extract_strided_slice %4 {offsets = [0, 12], sizes = [8, 4], strides = [1, 1]} : vector<8x96xf32> to vector<8x4xf32>
    %81 = arith.truncf %80 : vector<8x4xf32> to vector<8x4xbf16>
    %82 = vector.extract_strided_slice %4 {offsets = [0, 44], sizes = [8, 4], strides = [1, 1]} : vector<8x96xf32> to vector<8x4xf32>
    %83 = arith.truncf %82 : vector<8x4xf32> to vector<8x4xbf16>
    %84 = vector.extract_strided_slice %4 {offsets = [0, 76], sizes = [8, 4], strides = [1, 1]} : vector<8x96xf32> to vector<8x4xf32>
    %85 = arith.truncf %84 : vector<8x4xf32> to vector<8x4xbf16>
    "tpu.trace_start"() <{level = 10 : i32, message = "qd,kd->qk"}> : () -> ()
    %cst_28 = arith.constant dense<0.000000e+00> : vector<8x8xf32>
    %86 = tpu.matmul %81, %83, %cst_28 {dimension_numbers = #tpu.dot_dimension_numbers<[1], [1], [0], [0], [0, 0, 1, 0], [], []>} : vector<8x4xbf16>, vector<8x4xbf16>, vector<8x8xf32> -> vector<8x8xf32>
    "tpu.trace_stop"() : () -> ()
    %cst_29 = arith.constant dense<0xFF800000> : vector<8xf32>
    %87 = vector.multi_reduction <maximumf>, %86, %cst_29 [1] : vector<8x8xf32> to vector<8xf32>
    %88 = vector.shape_cast %87 : vector<8xf32> to vector<8x1xf32>
    %89 = vector.broadcast %88 : vector<8x1xf32> to vector<8x8xf32>
    %90 = arith.subf %86, %89 : vector<8x8xf32>
    %91 = math.exp %90 : vector<8x8xf32>
    %cst_30 = arith.constant dense<0.000000e+00> : vector<8xf32>
    %92 = vector.multi_reduction <add>, %91, %cst_30 [1] : vector<8x8xf32> to vector<8xf32>
    %93 = vector.shape_cast %92 : vector<8xf32> to vector<8x1xf32>
    %94 = tpu.reciprocal %93 {approx = true} : vector<8x1xf32> -> vector<8x1xf32>
    %95 = arith.truncf %91 : vector<8x8xf32> to vector<8x8xbf16>
    %cst_31 = arith.constant dense<0.000000e+00> : vector<8x4xf32>
    %96 = tpu.matmul %95, %85, %cst_31 {dimension_numbers = #tpu.dot_dimension_numbers<[1], [0], [0], [1], [0, 0, 1, 1], [], []>} : vector<8x8xbf16>, vector<8x4xbf16>, vector<8x4xf32> -> vector<8x4xf32>
    %97 = vector.broadcast %94 : vector<8x1xf32> to vector<8x4xf32>
    %98 = arith.mulf %96, %97 : vector<8x4xf32>
    %99 = arith.truncf %98 : vector<8x4xf32> to vector<8x4xbf16>
    %c3 = arith.constant 3 : index
    %c0_32 = arith.constant 0 : index
    %c0_33 = arith.constant 0 : index
    %100 = vector.load %arg3[%c3, %c0_32, %c0_33] : memref<8x4x32xbf16, #tpu.memory_space<vmem>>, vector<1x4x32xbf16>
    %101 = vector.shape_cast %100 : vector<1x4x32xbf16> to vector<4x32xbf16>
    %cst_34 = arith.constant dense<0.000000e+00> : vector<8x32xf32>
    %102 = tpu.matmul %99, %101, %cst_34 {dimension_numbers = #tpu.dot_dimension_numbers<[1], [0], [0], [1], [0, 0, 1, 1], [], []>} : vector<8x4xbf16>, vector<4x32xbf16>, vector<8x32xf32> -> vector<8x32xf32>
    %103 = arith.addf %79, %102 : vector<8x32xf32>
    %104 = vector.extract_strided_slice %4 {offsets = [0, 16], sizes = [8, 4], strides = [1, 1]} : vector<8x96xf32> to vector<8x4xf32>
    %105 = arith.truncf %104 : vector<8x4xf32> to vector<8x4xbf16>
    %106 = vector.extract_strided_slice %4 {offsets = [0, 48], sizes = [8, 4], strides = [1, 1]} : vector<8x96xf32> to vector<8x4xf32>
    %107 = arith.truncf %106 : vector<8x4xf32> to vector<8x4xbf16>
    %108 = vector.extract_strided_slice %4 {offsets = [0, 80], sizes = [8, 4], strides = [1, 1]} : vector<8x96xf32> to vector<8x4xf32>
    %109 = arith.truncf %108 : vector<8x4xf32> to vector<8x4xbf16>
    "tpu.trace_start"() <{level = 10 : i32, message = "qd,kd->qk"}> : () -> ()
    %cst_35 = arith.constant dense<0.000000e+00> : vector<8x8xf32>
    %110 = tpu.matmul %105, %107, %cst_35 {dimension_numbers = #tpu.dot_dimension_numbers<[1], [1], [0], [0], [0, 0, 1, 0], [], []>} : vector<8x4xbf16>, vector<8x4xbf16>, vector<8x8xf32> -> vector<8x8xf32>
    "tpu.trace_stop"() : () -> ()
    %cst_36 = arith.constant dense<0xFF800000> : vector<8xf32>
    %111 = vector.multi_reduction <maximumf>, %110, %cst_36 [1] : vector<8x8xf32> to vector<8xf32>
    %112 = vector.shape_cast %111 : vector<8xf32> to vector<8x1xf32>
    %113 = vector.broadcast %112 : vector<8x1xf32> to vector<8x8xf32>
    %114 = arith.subf %110, %113 : vector<8x8xf32>
    %115 = math.exp %114 : vector<8x8xf32>
    %cst_37 = arith.constant dense<0.000000e+00> : vector<8xf32>
    %116 = vector.multi_reduction <add>, %115, %cst_37 [1] : vector<8x8xf32> to vector<8xf32>
    %117 = vector.shape_cast %116 : vector<8xf32> to vector<8x1xf32>
    %118 = tpu.reciprocal %117 {approx = true} : vector<8x1xf32> -> vector<8x1xf32>
    %119 = arith.truncf %115 : vector<8x8xf32> to vector<8x8xbf16>
    %cst_38 = arith.constant dense<0.000000e+00> : vector<8x4xf32>
    %120 = tpu.matmul %119, %109, %cst_38 {dimension_numbers = #tpu.dot_dimension_numbers<[1], [0], [0], [1], [0, 0, 1, 1], [], []>} : vector<8x8xbf16>, vector<8x4xbf16>, vector<8x4xf32> -> vector<8x4xf32>
    %121 = vector.broadcast %118 : vector<8x1xf32> to vector<8x4xf32>
    %122 = arith.mulf %120, %121 : vector<8x4xf32>
    %123 = arith.truncf %122 : vector<8x4xf32> to vector<8x4xbf16>
    %c4 = arith.constant 4 : index
    %c0_39 = arith.constant 0 : index
    %c0_40 = arith.constant 0 : index
    %124 = vector.load %arg3[%c4, %c0_39, %c0_40] : memref<8x4x32xbf16, #tpu.memory_space<vmem>>, vector<1x4x32xbf16>
    %125 = vector.shape_cast %124 : vector<1x4x32xbf16> to vector<4x32xbf16>
    %cst_41 = arith.constant dense<0.000000e+00> : vector<8x32xf32>
    %126 = tpu.matmul %123, %125, %cst_41 {dimension_numbers = #tpu.dot_dimension_numbers<[1], [0], [0], [1], [0, 0, 1, 1], [], []>} : vector<8x4xbf16>, vector<4x32xbf16>, vector<8x32xf32> -> vector<8x32xf32>
    %127 = arith.addf %103, %126 : vector<8x32xf32>
    %128 = vector.extract_strided_slice %4 {offsets = [0, 20], sizes = [8, 4], strides = [1, 1]} : vector<8x96xf32> to vector<8x4xf32>
    %129 = arith.truncf %128 : vector<8x4xf32> to vector<8x4xbf16>
    %130 = vector.extract_strided_slice %4 {offsets = [0, 52], sizes = [8, 4], strides = [1, 1]} : vector<8x96xf32> to vector<8x4xf32>
    %131 = arith.truncf %130 : vector<8x4xf32> to vector<8x4xbf16>
    %132 = vector.extract_strided_slice %4 {offsets = [0, 84], sizes = [8, 4], strides = [1, 1]} : vector<8x96xf32> to vector<8x4xf32>
    %133 = arith.truncf %132 : vector<8x4xf32> to vector<8x4xbf16>
    "tpu.trace_start"() <{level = 10 : i32, message = "qd,kd->qk"}> : () -> ()
    %cst_42 = arith.constant dense<0.000000e+00> : vector<8x8xf32>
    %134 = tpu.matmul %129, %131, %cst_42 {dimension_numbers = #tpu.dot_dimension_numbers<[1], [1], [0], [0], [0, 0, 1, 0], [], []>} : vector<8x4xbf16>, vector<8x4xbf16>, vector<8x8xf32> -> vector<8x8xf32>
    "tpu.trace_stop"() : () -> ()
    %cst_43 = arith.constant dense<0xFF800000> : vector<8xf32>
    %135 = vector.multi_reduction <maximumf>, %134, %cst_43 [1] : vector<8x8xf32> to vector<8xf32>
    %136 = vector.shape_cast %135 : vector<8xf32> to vector<8x1xf32>
    %137 = vector.broadcast %136 : vector<8x1xf32> to vector<8x8xf32>
    %138 = arith.subf %134, %137 : vector<8x8xf32>
    %139 = math.exp %138 : vector<8x8xf32>
    %cst_44 = arith.constant dense<0.000000e+00> : vector<8xf32>
    %140 = vector.multi_reduction <add>, %139, %cst_44 [1] : vector<8x8xf32> to vector<8xf32>
    %141 = vector.shape_cast %140 : vector<8xf32> to vector<8x1xf32>
    %142 = tpu.reciprocal %141 {approx = true} : vector<8x1xf32> -> vector<8x1xf32>
    %143 = arith.truncf %139 : vector<8x8xf32> to vector<8x8xbf16>
    %cst_45 = arith.constant dense<0.000000e+00> : vector<8x4xf32>
    %144 = tpu.matmul %143, %133, %cst_45 {dimension_numbers = #tpu.dot_dimension_numbers<[1], [0], [0], [1], [0, 0, 1, 1], [], []>} : vector<8x8xbf16>, vector<8x4xbf16>, vector<8x4xf32> -> vector<8x4xf32>
    %145 = vector.broadcast %142 : vector<8x1xf32> to vector<8x4xf32>
    %146 = arith.mulf %144, %145 : vector<8x4xf32>
    %147 = arith.truncf %146 : vector<8x4xf32> to vector<8x4xbf16>
    %c5 = arith.constant 5 : index
    %c0_46 = arith.constant 0 : index
    %c0_47 = arith.constant 0 : index
    %148 = vector.load %arg3[%c5, %c0_46, %c0_47] : memref<8x4x32xbf16, #tpu.memory_space<vmem>>, vector<1x4x32xbf16>
    %149 = vector.shape_cast %148 : vector<1x4x32xbf16> to vector<4x32xbf16>
    %cst_48 = arith.constant dense<0.000000e+00> : vector<8x32xf32>
    %150 = tpu.matmul %147, %149, %cst_48 {dimension_numbers = #tpu.dot_dimension_numbers<[1], [0], [0], [1], [0, 0, 1, 1], [], []>} : vector<8x4xbf16>, vector<4x32xbf16>, vector<8x32xf32> -> vector<8x32xf32>
    %151 = arith.addf %127, %150 : vector<8x32xf32>
    %152 = vector.extract_strided_slice %4 {offsets = [0, 24], sizes = [8, 4], strides = [1, 1]} : vector<8x96xf32> to vector<8x4xf32>
    %153 = arith.truncf %152 : vector<8x4xf32> to vector<8x4xbf16>
    %154 = vector.extract_strided_slice %4 {offsets = [0, 56], sizes = [8, 4], strides = [1, 1]} : vector<8x96xf32> to vector<8x4xf32>
    %155 = arith.truncf %154 : vector<8x4xf32> to vector<8x4xbf16>
    %156 = vector.extract_strided_slice %4 {offsets = [0, 88], sizes = [8, 4], strides = [1, 1]} : vector<8x96xf32> to vector<8x4xf32>
    %157 = arith.truncf %156 : vector<8x4xf32> to vector<8x4xbf16>
    "tpu.trace_start"() <{level = 10 : i32, message = "qd,kd->qk"}> : () -> ()
    %cst_49 = arith.constant dense<0.000000e+00> : vector<8x8xf32>
    %158 = tpu.matmul %153, %155, %cst_49 {dimension_numbers = #tpu.dot_dimension_numbers<[1], [1], [0], [0], [0, 0, 1, 0], [], []>} : vector<8x4xbf16>, vector<8x4xbf16>, vector<8x8xf32> -> vector<8x8xf32>
    "tpu.trace_stop"() : () -> ()
    %cst_50 = arith.constant dense<0xFF800000> : vector<8xf32>
    %159 = vector.multi_reduction <maximumf>, %158, %cst_50 [1] : vector<8x8xf32> to vector<8xf32>
    %160 = vector.shape_cast %159 : vector<8xf32> to vector<8x1xf32>
    %161 = vector.broadcast %160 : vector<8x1xf32> to vector<8x8xf32>
    %162 = arith.subf %158, %161 : vector<8x8xf32>
    %163 = math.exp %162 : vector<8x8xf32>
    %cst_51 = arith.constant dense<0.000000e+00> : vector<8xf32>
    %164 = vector.multi_reduction <add>, %163, %cst_51 [1] : vector<8x8xf32> to vector<8xf32>
    %165 = vector.shape_cast %164 : vector<8xf32> to vector<8x1xf32>
    %166 = tpu.reciprocal %165 {approx = true} : vector<8x1xf32> -> vector<8x1xf32>
    %167 = arith.truncf %163 : vector<8x8xf32> to vector<8x8xbf16>
    %cst_52 = arith.constant dense<0.000000e+00> : vector<8x4xf32>
    %168 = tpu.matmul %167, %157, %cst_52 {dimension_numbers = #tpu.dot_dimension_numbers<[1], [0], [0], [1], [0, 0, 1, 1], [], []>} : vector<8x8xbf16>, vector<8x4xbf16>, vector<8x4xf32> -> vector<8x4xf32>
    %169 = vector.broadcast %166 : vector<8x1xf32> to vector<8x4xf32>
    %170 = arith.mulf %168, %169 : vector<8x4xf32>
    %171 = arith.truncf %170 : vector<8x4xf32> to vector<8x4xbf16>
    %c6 = arith.constant 6 : index
    %c0_53 = arith.constant 0 : index
    %c0_54 = arith.constant 0 : index
    %172 = vector.load %arg3[%c6, %c0_53, %c0_54] : memref<8x4x32xbf16, #tpu.memory_space<vmem>>, vector<1x4x32xbf16>
    %173 = vector.shape_cast %172 : vector<1x4x32xbf16> to vector<4x32xbf16>
    %cst_55 = arith.constant dense<0.000000e+00> : vector<8x32xf32>
    %174 = tpu.matmul %171, %173, %cst_55 {dimension_numbers = #tpu.dot_dimension_numbers<[1], [0], [0], [1], [0, 0, 1, 1], [], []>} : vector<8x4xbf16>, vector<4x32xbf16>, vector<8x32xf32> -> vector<8x32xf32>
    %175 = arith.addf %151, %174 : vector<8x32xf32>
    %176 = vector.extract_strided_slice %4 {offsets = [0, 28], sizes = [8, 4], strides = [1, 1]} : vector<8x96xf32> to vector<8x4xf32>
    %177 = arith.truncf %176 : vector<8x4xf32> to vector<8x4xbf16>
    %178 = vector.extract_strided_slice %4 {offsets = [0, 60], sizes = [8, 4], strides = [1, 1]} : vector<8x96xf32> to vector<8x4xf32>
    %179 = arith.truncf %178 : vector<8x4xf32> to vector<8x4xbf16>
    %180 = vector.extract_strided_slice %4 {offsets = [0, 92], sizes = [8, 4], strides = [1, 1]} : vector<8x96xf32> to vector<8x4xf32>
    %181 = arith.truncf %180 : vector<8x4xf32> to vector<8x4xbf16>
    "tpu.trace_start"() <{level = 10 : i32, message = "qd,kd->qk"}> : () -> ()
    %cst_56 = arith.constant dense<0.000000e+00> : vector<8x8xf32>
    %182 = tpu.matmul %177, %179, %cst_56 {dimension_numbers = #tpu.dot_dimension_numbers<[1], [1], [0], [0], [0, 0, 1, 0], [], []>} : vector<8x4xbf16>, vector<8x4xbf16>, vector<8x8xf32> -> vector<8x8xf32>
    "tpu.trace_stop"() : () -> ()
    %cst_57 = arith.constant dense<0xFF800000> : vector<8xf32>
    %183 = vector.multi_reduction <maximumf>, %182, %cst_57 [1] : vector<8x8xf32> to vector<8xf32>
    %184 = vector.shape_cast %183 : vector<8xf32> to vector<8x1xf32>
    %185 = vector.broadcast %184 : vector<8x1xf32> to vector<8x8xf32>
    %186 = arith.subf %182, %185 : vector<8x8xf32>
    %187 = math.exp %186 : vector<8x8xf32>
    %cst_58 = arith.constant dense<0.000000e+00> : vector<8xf32>
    %188 = vector.multi_reduction <add>, %187, %cst_58 [1] : vector<8x8xf32> to vector<8xf32>
    %189 = vector.shape_cast %188 : vector<8xf32> to vector<8x1xf32>
    %190 = tpu.reciprocal %189 {approx = true} : vector<8x1xf32> -> vector<8x1xf32>
    %191 = arith.truncf %187 : vector<8x8xf32> to vector<8x8xbf16>
    %cst_59 = arith.constant dense<0.000000e+00> : vector<8x4xf32>
    %192 = tpu.matmul %191, %181, %cst_59 {dimension_numbers = #tpu.dot_dimension_numbers<[1], [0], [0], [1], [0, 0, 1, 1], [], []>} : vector<8x8xbf16>, vector<8x4xbf16>, vector<8x4xf32> -> vector<8x4xf32>
    %193 = vector.broadcast %190 : vector<8x1xf32> to vector<8x4xf32>
    %194 = arith.mulf %192, %193 : vector<8x4xf32>
    %195 = arith.truncf %194 : vector<8x4xf32> to vector<8x4xbf16>
    %c7 = arith.constant 7 : index
    %c0_60 = arith.constant 0 : index
    %c0_61 = arith.constant 0 : index
    %196 = vector.load %arg3[%c7, %c0_60, %c0_61] : memref<8x4x32xbf16, #tpu.memory_space<vmem>>, vector<1x4x32xbf16>
    %197 = vector.shape_cast %196 : vector<1x4x32xbf16> to vector<4x32xbf16>
    %cst_62 = arith.constant dense<0.000000e+00> : vector<8x32xf32>
    %198 = tpu.matmul %195, %197, %cst_62 {dimension_numbers = #tpu.dot_dimension_numbers<[1], [0], [0], [1], [0, 0, 1, 1], [], []>} : vector<8x4xbf16>, vector<4x32xbf16>, vector<8x32xf32> -> vector<8x32xf32>
    %199 = arith.addf %175, %198 : vector<8x32xf32>
    %c0_63 = arith.constant 0 : index
    %c0_64 = arith.constant 0 : index
    %c0_65 = arith.constant 0 : index
    %200 = vector.load %arg5[%c0_63, %c0_64, %c0_65] : memref<1x8x32xf32, #tpu.memory_space<vmem>>, vector<1x8x32xf32>
    %201 = vector.shape_cast %200 : vector<1x8x32xf32> to vector<8x32xf32>
    %202 = vector.shape_cast %199 : vector<8x32xf32> to vector<1x8x32xf32>
    tpu.vector_store %arg5[%c0_63, %c0_64, %c0_65], %202 {strides = array<i32>} : memref<1x8x32xf32, #tpu.memory_space<vmem>>, vector<1x8x32xf32>,
    return
  }
  func.func @transform_0(%arg0: i32) -> (i32, i32, i32) {
    %c0_i32 = arith.constant 0 : i32
    %c0_i32_0 = arith.constant 0 : i32
    %c0_i32_1 = arith.constant 0 : i32
    return %arg0, %c0_i32, %c0_i32_0 : i32, i32, i32
  }
  func.func @transform_1(%arg0: i32) -> (i32, i32) {
    %c0_i32 = arith.constant 0 : i32
    %c0_i32_0 = arith.constant 0 : i32
    %c0_i32_1 = arith.constant 0 : i32
    return %c0_i32, %c0_i32_0 : i32, i32
  }
  func.func @transform_2(%arg0: i32) -> (i32, i32, i32) {
    %c0_i32 = arith.constant 0 : i32
    %c0_i32_0 = arith.constant 0 : i32
    %c0_i32_1 = arith.constant 0 : i32
    %c0_i32_2 = arith.constant 0 : i32
    return %c0_i32, %c0_i32_0, %c0_i32_1 : i32, i32, i32
  }
  func.func @transform_3(%arg0: i32) -> (i32, i32) {
    %c0_i32 = arith.constant 0 : i32
    %c0_i32_0 = arith.constant 0 : i32
    %c0_i32_1 = arith.constant 0 : i32
    return %c0_i32, %c0_i32_0 : i32, i32
  }
  func.func @transform_4(%arg0: i32) -> (i32, i32, i32) {
    %c0_i32 = arith.constant 0 : i32
    %c0_i32_0 = arith.constant 0 : i32
    %c0_i32_1 = arith.constant 0 : i32
    return %arg0, %c0_i32, %c0_i32_0 : i32, i32, i32
  }
}

</mosaic_0001>

<bundles_post_ra>
// kernel: tpu_custom_call.1
= control target key start
LH: loop header
LB: loop body
LE: loop exit
PB: predicated region body
PF: predicated region fallthrough
CT: control target
= control target key end

     0   :  { %9 = vsyncpa [#allocation3], 0  ;;  %s1670_s0 = inlined_call_operand.hbm [shape: f32[2,8,32], index: 0, kind: input, shape index: {}]   ;;  %s1671_s1 = inlined_call_operand.hbm [shape: bf16[32,96], index: 1, kind: input, shape index: {}]   ;;  %s1672_s2 = inlined_call_operand.hbm [shape: bf16[8,4,32], index: 2, kind: input, shape index: {}]   ;;  %s1673_s3 = inlined_call_operand.vmem [shape: f32[1,32], index: 3, kind: input, shape index: {}]   ;;  %s1674_s4 = inlined_call_operand.hbm [shape: f32[2,8,32], index: 4, kind: output, shape index: {}]  }
   0x1   :  { %11 = vsyncpa [#allocation3 + $0x1], 0 }
   0x2   :  { %12 = vsyncpa [#allocation6], 0 }
   0x3   :  { %13 = vsyncpa [#allocation4], 0 }
   0x4   :  { %15 = vsyncpa [#allocation4 + $0x1], 0  ;;  %s1423_s15 = smov 0   ;;  %s1425_s16 = smov 0  }
   0x5   :  { %s1427_s17 = smov 0   ;;  %s1429_s18 = smov 0  }
   0x6 LB: > { %s152_s21 = sshll.u32 %s1671_s1, 4  ;;  %s1447_s22 = sadd.s32 4294967295, %s1367_s18   ;;  %s1367_s18 = sphi %s1429_s18, %s1685_s18   ;;  %s1363_s17 = sphi %s1427_s17, %s1684_s17   ;;  %s1359_s16 = sphi %s1425_s16, %s1683_s16   ;;  %s1355_s15 = sphi %s1423_s15, %s1682_s15   ;;  %s153_s21 = int_to_ptr.hbm [resolvable:$true] %s152_s21 }
   0x7   : > { %p1030_p0 = scmp.ge.s32.totalorder %s1367_s18, 1  ;;  %p42_p1 = scmp.eq.s32.totalorder %s1447_s22, 0 }
   0x8   : > { %p141_p2 = scmp.lt.s32.totalorder %s1367_s18, 3  ;;  %s1369_s24 = smov [#allocation5]  }
   0x9   : > { %s154_s25 = sshll.u32 %s1369_s24, 4  ;;  %s166_s28 = sshll.u32 %s1672_s2, 4  ;;  %s155_s25 = int_to_ptr.vmem [resolvable:$true] %s154_s25  ;;  %s167_s28 = int_to_ptr.hbm [resolvable:$true] %s166_s28 }
   0xa   : > { %p1452_p3 = pnand %p1030_p0, %p141_p2  ;;  %s1370_s29 = smov [#allocation7]  }
   0xb   : > { %s168_s30 = sshll.u32 %s1370_s29, 4  ;;  %s1371_s5 = smov 64   ;;  %s169_s30 = int_to_ptr.vmem [resolvable:$true] %s168_s30 }
   0xc   : > { %p1092_p4 = pneg %p1452_p3  ;;  %s1372_s6 = smov 4  }
   0xd   : > { %s1373_s7 = smov 32   ;;  %s1374_s8 = smov 2  }
   0xe   : > { %p1093_p6 = pnand %p1092_p4, %p42_p1  ;;  %s1029_s9 = sadd.s32 4294967294, %s1367_s18  }
   0xf   : > { %s1466_s10 = sadd.s32 1, %s1367_s18   ;;  %s28_s12 = sadd.s32 1, %s1363_s17 }
  0x10   : > { %1095 = dma.hbm_to_vmem [thread:$0]  (!%p1093_p6), %s153_s21, 256, %s155_s25, [#allocation6], %s1371_s5, %s1371_s5, %s1372_s6  }
  0x11   : > { %1098 = dma.hbm_to_vmem [thread:$0]  (!%p1093_p6), %s167_s28, 256, %s169_s30, [#allocation6], %s1373_s7, %s1373_s7, %s1374_s8  }
  0x12   : > { %s25_s11 = ssub.s32 %s1367_s18, %s1466_s10  ;;  %p35_p8 = scmp.ne.s32.totalorder %s1363_s17, %s1359_s16 }
  0x13   : > { %p26_p7 = scmp.eq.s32.totalorder %s25_s11, 0  ;;  %p36_p9 = scmp.eq.s32.totalorder %s1367_s18, 0 }
  0x14   : > { %p41_p10 = scmp.ne.s32.totalorder %s1359_s16, %s1355_s15  ;;  %p128_p13 = scmp.eq.s32.totalorder %s1447_s22, 1 }
  0x15   : > { %s1477_s13 = scalar_select %p26_p7, %s1363_s17, %s28_s12  }
  0x16   : > { %p1479_p11 = por %p36_p9, %p35_p8  ;;  %p1485_p12 = por %p42_p1, %p41_p10 }
  0x17   : > { %p134_p0 = scmp.eq.s32.totalorder %s1029_s9, 1  ;;  %p1109_p2 = scmp.lt.s32.totalorder %s1367_s18, 2 }
  0x18   : > { %s185_s20 = sand.u32 1, %s1363_s17   ;;  %p1492_p4 = por %p128_p13, %p35_p8 }
  0x19   : > { %p1496_p6 = por %p134_p0, %p41_p10  ;;  %s1034_s25 = sshll.u32 %s185_s20, 3 }
  0x1a   : > { %s1035_s26 = sshll.u32 %s1367_s18, 3  ;;  %s189_s30 = scalar_lea.vmem [#allocation2], %s1034_s25 }
  0x1b   : > { %s193_s29 = scalar_lea.hbm %s1670_s0, %s1035_s26  ;;  %s197_s5 = sshll.u32 %s189_s30, 4  ;;  %s198_s5 = int_to_ptr.vmem [resolvable:$true] %s197_s5 }
  0x1c   : > { %s195_s6 = sshll.u32 %s193_s29, 4  ;;  %p1506_p7 = pnand %p1109_p2, %p1479_p11  ;;  %s196_s6 = int_to_ptr.hbm [resolvable:$true] %s195_s6 }
  0x1d   : > { %s186_s8 = scalar_lea.sflag [#allocation3], %s185_s20  ;;  %s1267_s9 = sshra.s32 %s196_s6, 4  ;;  %s1268_s9 = int_to_ptr.hbm [resolvable:$true] %s1267_s9 }
  0x1e   : > { %s1269_s11 = scalar_lea.hbm %s1268_s9, 8  ;;  %p1271_p9 = pneg %p1506_p7 }
  0x1f   : > { %p1270_p8 = scmp.ne.s32.totalorder %s1268_s9, %s1269_s11  ;;  %s1274_s26 = scalar_lea.hbm %s1670_s0, 16 }
  0x20   : > { %p1275_p11 = scmp.lt.s32.totalorder %s1268_s9, %s1670_s0  ;;  %p1276_p0 = scmp.lt.s32.totalorder %s1274_s26, %s1269_s11 }
  0x21   : > { %p1272_p10 = pnand %p1271_p9, %p1270_p8 }
  0x22   : > { %p1277_p2 = por %p1276_p0, %p1275_p11 }
  0x23   : > { %p1273_p13 = pneg %p1272_p10 }
  0x25   : > { %p1278_p5 = pnand %p1277_p2, %p1273_p13 }
  0x27   : > { %1281 = shalt.err (!%p1278_p5)
}
  0x28   : > { %1102 = dma.hbm_to_vmem [thread:$0]  (!%p1506_p7), %s196_s6, 128, %s198_s5, %s186_s8  }
  0x29   : > { %206 = sbr.rel (%p1452_p3) target bundleno = 2337 (0x921), region = 36  ;;  %s1523_s20 = sand.u32 (!%p1452_p3), 1, %s1359_s16  }
  0x2a   : > { %s1037_s28 = sshll.u32 (!%p1452_p3), %s1523_s20, 3  ;;  %s209_s29 = scalar_lea.sflag (!%p1452_p3), [#allocation3], %s1523_s20 }
  0x2b   : > { %s212_s30 = scalar_lea.vmem (!%p1452_p3), [#allocation2], %s1037_s28 }
  0x2e   : > { %1342 = dma.done.wait (%p1485_p12), %s209_s29, 128  }
  0x2f   : > { %1344 = vsyncadd (%p1485_p12), %s209_s29, 4294967168 }
  0x30   : > { %1346 = dma.done.wait (%p42_p1), [#allocation6], 512  }
  0x31   : > { %1348 = vsyncadd (%p42_p1), [#allocation6], 4294966784  ;;  %v1079_v0 = vld [vmem:[#allocation5 + $0x8] sm:$0xff]  ;;  %v1078_v1 = vld [vmem:[#allocation5] sm:$0xff]  ;;  %vm267_vm0 = vcmask 261120   ;;  %s1375_s23 = smov 124  }
  0x32   : > { %277 = vmatpush.bf16.msra.mxu0 %v1079_v0  ;;  %v249_v2 = vld [vmem:[%s212_s30] sm:$0xff]  ;;  %s1376_s19 = smov 64   ;;  %s1377_s5 = smov 96   ;;  %vm329_vm1 = vcmask 1043456   ;;  %vm292_vm2 = vcmask 31744   ;;  %vm312_vm3 = vcmask 64512  }
  0x33   : > { %v250_v3 = vpack.c.bf16 %v249_v2, %v249_v2  ;;  %s1378_s6 = smov 92   ;;  %s1379_s7 = smov 88   ;;  %v348_v25 = vld [vmem:[#allocation7] sm:$0x3]  ;;  %vm352_vm4 = vcmask 1041408  }
  0x34   : > { %s1380_s8 = smov 60   ;;  %s1381_s9 = smov 120   ;;  %v354_v26 = vsel %vm352_vm4, %v348_v25, 0  ;;  %v428_v39 = vld [vmem:[#allocation7 + $0x2] sm:$0x3] }
  0x35   : > { %363 = vmatpush.bf16.msra.mxu3 %v354_v26  ;;  %s1382_s11 = smov 84   ;;  %v433_v41 = vsel %vm352_vm4, %v428_v39, 0  ;;  %s1383_s12 = smov 116  }
  0x36   : > { %278 = vmatpush.bf16.msra.mxu0 %v1078_v1  ;;  %s1384_s25 = smov 56   ;;  %s1385_s26 = smov 52  }
  0x37   : > { %s1386_s27 = smov 112   ;;  %s1387_s14 = smov 48  }
  0x38   : > { %s1388_s29 = smov 44   ;;  %s247_s30 = scalar_lea.vmem [#allocation8], %s1037_s28 }
  0x39   : > { %1049 = vmatmul.msk.bf16.vlgmr.msra.gmra.mxu0 %vm267_vm0, %v250_v3  ;;  %s1317_s28 = scalar_lea.hbm %s1674_s4, 16 }
  0x3a   : > { %442 = vmatpush.bf16.msrb.mxu0 %v433_v41 }
  0xb6   : > { %v280_v4 = vpop.f32.mrf.mxu0 }
  0xb7   : > { %v1538_v5 = vpack.c.bf16 %v280_v4, %v280_v4 }
  0xb9   : > { %370 = vrot.lane.b32.xlu2 %v1538_v5, %s1375_s23  ;;  %324 = vrot.lane.b32.xlu1 %v1538_v5, %s1376_s19  ;;  %s1389_s19 = smov 80   ;;  %s937_s23 = sshll.u32 %s247_s30, 4  ;;  %s938_s23 = int_to_ptr.vmem [resolvable:$true] %s937_s23 }
  0xba   : > { %290 = vrot.lane.b32.xlu0 %v1538_v5, %s1377_s5  ;;  %s1390_s5 = smov 108  }
  0xbe   : > { %v282_v6 = vpop.f32.mrf.mxu0 }
  0xc1   : > { %372 = vrot.lane.b32.xlu1 %v1538_v5, %s1378_s6  ;;  %s1391_s6 = smov 76  }
 0x113   : > { %v371_v24 = vpop.permute.xlu2 %370 }
 0x12b   : > { %v325_v7 = vpop.permute.xlu1 %324 }
 0x12c   : > { %v291_v8 = vpop.permute.xlu0 %290  ;;  %v331_v9 = vsel %vm329_vm1, %v325_v7, 0 }
 0x12d   : > { %v297_v10 = vsel %vm292_vm2, %v291_v8, 0  ;;  %340 = vmatpush.bf16.msra.mxu2 %v331_v9 }
 0x12e   : > { %306 = vmatpush.bf16.xpose.msra.mxu1 %v297_v10  ;;  %v507_v10 = vld [vmem:[#allocation7 + $0x4] sm:$0x3] }
 0x133   : > { %v373_v11 = vpop.permute.xlu1 %372 }
 0x134   : > { %v378_v12 = vsel %vm292_vm2, %v373_v11, 0  ;;  %v512_v11 = vsel %vm352_vm4, %v507_v10, 0 }
 0x135   : > { %1050 = vmatmul.msk.bf16.vlgmr.msra.gmra.mxu1 %vm292_vm2, %v1538_v5  ;;  %387 = vmatpush.bf16.xpose.msrb.mxu2 %v378_v12 }
 0x1b2   : > { %v308_v13 = vpop.f32.mrf.mxu1 }
 0x1b3   : > { %v313_v14 = vsel %vm312_vm3, %v308_v13, -inf }
 0x1b4   : > { %314 = vmax.xlane.f32.xlu0 %v313_v14  ;;  %v1174_v14 = vld [vmem:[%s1673_s3] ss:$0 sm:$0xff] }
 0x1ba   : > { %v310_v15 = vpop.f32.mrf.mxu1 }
 0x1c8   : > { %451 = vrot.lane.b32.xlu0 %v1538_v5, %s1379_s7  ;;  %s1392_s7 = smov 104  }
 0x227   : > { %v315_v16 = vpop.xlane.xlu0 %314 }
 0x228   : > { %v316_v17 = vsub.f32 %v308_v13, %v315_v16 }
 0x22a   : > { %v317_v18 = vmul.f32 1.442695, %v316_v17 }
 0x22c   : > { %1175 = vpow2.f32 %v317_v18 }
 0x232   : > { %v1176_v19 = vpop.eup %1175 }
 0x233   : > { %v319_v20 = vsel %vm312_vm3, %v1176_v19, 0.0  ;;  %v323_v21 = vpack.c.bf16 %v1176_v19, %v1176_v19 }
 0x234   : > { %320 = vadd.xlane.f32.xlu2 %v319_v20 }
 0x235   : > { %1051 = vmatmul.msk.bf16.vlgmr.msra.gmra.mxu2 %vm312_vm3, %v323_v21 }
 0x23a   : > { %v452_v22 = vpop.permute.xlu0 %451 }
 0x23b   : > { %v457_v23 = vsel %vm292_vm2, %v452_v22, 0 }
 0x23c   : > { %466 = vmatpush.bf16.xpose.msrb.mxu1 %v457_v23 }
 0x245   : > { %1053 = vmatmul.msk.bf16.vlgmr.msrb.gmra.mxu2 %vm292_vm2, %v371_v24 }
 0x24c   : > { %404 = vrot.lane.b32.xlu2 %v1538_v5, %s1380_s8  ;;  %s1393_s8 = smov 72  }
 0x254   : > { %449 = vrot.lane.b32.xlu2 %v1538_v5, %s1381_s9  ;;  %s1394_s9 = smov 40  }
 0x2a7   : > { %v321_v27 = vpop.xlane.xlu2 %320 }
 0x2a8   : > { %1177 = vrcp.f32 %v321_v27 }
 0x2ae   : > { %v1178_v31 = vpop.eup %1177 }
 0x2af   : > { %v405_v28 = vpop.permute.xlu2 %404 }
 0x2b0   : > { %v410_v29 = vsel %vm329_vm1, %v405_v28, 0 }
 0x2b1   : > { %419 = vmatpush.bf16.msrb.mxu3 %v410_v29 }
 0x2b7   : > { %v450_v30 = vpop.permute.xlu2 %449 }
 0x2b8   : > { %v342_v32 = vpop.f32.mrf.mxu2  ;;  %1056 = vmatmul.msk.bf16.vlgmr.msrb.gmra.mxu1 %vm292_vm2, %v450_v30  ;;  %v586_v30 = vld [vmem:[#allocation7 + $0x6] sm:$0x3] }
 0x2b9   : > { %v346_v33 = vmul.f32 %v1178_v31, %v342_v32  ;;  %v591_v31 = vsel %vm352_vm4, %v586_v30, 0 }
 0x2bb   : > { %v347_v34 = vpack.c.bf16 %v346_v33, %v346_v33 }
 0x2bd   : > { %1052 = vmatmul.msk.bf16.vlgmr.msra.gmra.mxu3 %vm292_vm2, %v347_v34 }
 0x2be   : > { %521 = vmatpush.bf16.msra.mxu3 %v512_v11 }
 0x2c0   : > { %v344_v35 = vpop.f32.mrf.mxu2 }
 0x2c8   : > { %v389_v36 = vpop.f32.mrf.mxu2 }
 0x2c9   : > { %v393_v37 = vsel %vm312_vm3, %v389_v36, -inf }
 0x2ca   : > { %394 = vmax.xlane.f32.xlu1 %v393_v37 }
 0x2d0   : > { %v391_v38 = vpop.f32.mrf.mxu2 }
 0x2e3   : > { %530 = vrot.lane.b32.xlu1 %v1538_v5, %s1382_s11  ;;  %s1395_s11 = smov 100  }
 0x335   : > { %v468_v40 = vpop.f32.mrf.mxu1 }
 0x336   : > { %v472_v42 = vsel %vm312_vm3, %v468_v40, -inf }
 0x337   : > { %473 = vmax.xlane.f32.xlu2 %v472_v42 }
 0x33d   : > { %v395_v43 = vpop.xlane.xlu1 %394  ;;  %v470_v44 = vpop.f32.mrf.mxu1 }
 0x33e   : > { %v396_v45 = vsub.f32 %v389_v36, %v395_v43 }
 0x340   : > { %v397_v46 = vmul.f32 1.442695, %v396_v45  ;;  %v365_v47 = vpop.f32.mrf.mxu3 }
 0x341   : > { %v369_v15 = vadd.f32 %v1174_v14, %v365_v47 }
 0x342   : > { %1179 = vpow2.f32 %v397_v46 }
 0x348   : > { %v1180_v48 = vpop.eup %1179  ;;  %v367_v49 = vpop.f32.mrf.mxu3 }
 0x349   : > { %v399_v50 = vsel %vm312_vm3, %v1180_v48, 0.0  ;;  %v403_v51 = vpack.c.bf16 %v1180_v48, %v1180_v48 }
 0x34a   : > { %400 = vadd.xlane.f32.xlu0 %v399_v50 }
 0x34b   : > { %1054 = vmatmul.msk.bf16.vlgmr.msrb.gmra.mxu3 %vm312_vm3, %v403_v51 }
 0x355   : > { %v531_v52 = vpop.permute.xlu1 %530 }
 0x356   : > { %v536_v53 = vsel %vm292_vm2, %v531_v52, 0 }
 0x357   : > { %545 = vmatpush.bf16.xpose.msra.mxu0 %v536_v53 }
 0x35e   : > { %528 = vrot.lane.b32.xlu0 %v1538_v5, %s1383_s12  ;;  %s1396_s12 = smov 36  }
 0x366   : > { %483 = vrot.lane.b32.xlu0 %v1538_v5, %s1384_s25  ;;  %s1397_s25 = smov 68  }
 0x36e   : > { %562 = vrot.lane.b32.xlu0 %v1538_v5, %s1385_s26  ;;  %s1075_s26 = sshll.u32 %s1447_s22, 3 }
 0x3aa   : > { %v474_v54 = vpop.xlane.xlu2 %473 }
 0x3ab   : > { %v475_v55 = vsub.f32 %v468_v40, %v474_v54 }
 0x3ad   : > { %v476_v56 = vmul.f32 1.442695, %v475_v55 }
 0x3af   : > { %1181 = vpow2.f32 %v476_v56 }
 0x3b5   : > { %v1182_v57 = vpop.eup %1181 }
 0x3b6   : > { %v478_v58 = vsel %vm312_vm3, %v1182_v57, 0.0  ;;  %v482_v4 = vpack.c.bf16 %v1182_v57, %v1182_v57 }
 0x3b7   : > { %479 = vadd.xlane.f32.xlu0 %v478_v58 }
 0x3bd   : > { %v401_v59 = vpop.xlane.xlu0 %400 }
 0x3be   : > { %1183 = vrcp.f32 %v401_v59 }
 0x3c4   : > { %v1184_v60 = vpop.eup %1183 }
 0x3cb   : > { %607 = vrot.lane.b32.xlu0 %v1538_v5, %s1386_s27 }
 0x3ce   : > { %v421_v61 = vpop.f32.mrf.mxu3 }
 0x3cf   : > { %v425_v62 = vmul.f32 %v1184_v60, %v421_v61 }
 0x3d0   : > { %v529_v63 = vpop.permute.xlu0 %528 }
 0x3d1   : > { %v426_v0 = vpack.c.bf16 %v425_v62, %v425_v62 }
 0x3d3   : > { %1055 = vmatmul.msk.bf16.vlgmr.msrb.gmra.mxu0 %vm292_vm2, %v426_v0  ;;  %641 = vrot.lane.b32.xlu0 %v1538_v5, %s1387_s14 }
 0x3d6   : > { %v423_v1 = vpop.f32.mrf.mxu3 }
 0x3d8   : > { %v484_v2 = vpop.permute.xlu0 %483 }
 0x3d9   : > { %v489_v3 = vsel %vm329_vm1, %v484_v2, 0  ;;  %v665_v2 = vld [vmem:[#allocation7 + $0x8] sm:$0x3] }
 0x3da   : > { %498 = vmatpush.bf16.msra.mxu2 %v489_v3  ;;  %v670_v3 = vsel %vm352_vm4, %v665_v2, 0 }
 0x3db   : > { %720 = vrot.lane.b32.xlu0 %v1538_v5, %s1388_s29  ;;  %s935_s29 = scalar_lea.hbm %s1674_s4, %s1075_s26 }
 0x3dd   : > { %1057 = vmatmul.msk.bf16.vlgmr.msra.gmra.mxu2 %vm312_vm3, %v482_v4 }
 0x3de   : > { %600 = vmatpush.bf16.msrb.mxu2 %v591_v31 }
 0x3e0   : > { %v563_v6 = vpop.permute.xlu0 %562 }
 0x3e1   : > { %v568_v7 = vsel %vm329_vm1, %v563_v6, 0 }
 0x3e2   : > { %577 = vmatpush.bf16.msra.mxu1 %v568_v7 }
 0x3e3   : > { %1059 = vmatmul.msk.bf16.vlgmr.msra.gmra.mxu0 %vm292_vm2, %v529_v63 }
 0x3e6   : > { %679 = vmatpush.bf16.msrb.mxu1 %v670_v3 }
 0x42a   : > { %v480_v8 = vpop.xlane.xlu0 %479 }
 0x42b   : > { %1185 = vrcp.f32 %v480_v8 }
 0x431   : > { %v1186_v19 = vpop.eup %1185 }
 0x43d   : > { %v608_v9 = vpop.permute.xlu0 %607 }
 0x445   : > { %v642_v12 = vpop.permute.xlu0 %641 }
 0x446   : > { %v647_v13 = vsel %vm329_vm1, %v642_v12, 0 }
 0x447   : > { %656 = vmatpush.bf16.msrb.mxu0 %v647_v13 }
 0x44d   : > { %v721_v37 = vpop.permute.xlu0 %720 }
 0x44e   : > { %v726_v40 = vsel %vm329_vm1, %v721_v37, 0 }
 0x450   : > { %v444_v16 = vpop.f32.mrf.mxu0 }
 0x451   : > { %v448_v17 = vadd.f32 %v444_v16, %v369_v15 }
 0x458   : > { %v446_v18 = vpop.f32.mrf.mxu0 }
 0x460   : > { %v500_v20 = vpop.f32.mrf.mxu2  ;;  %v547_v21 = vpop.f32.mrf.mxu0 }
 0x461   : > { %v504_v22 = vmul.f32 %v1186_v19, %v500_v20  ;;  %v551_v23 = vsel %vm312_vm3, %v547_v21, -inf }
 0x462   : > { %552 = vmax.xlane.f32.xlu1 %v551_v23 }
 0x463   : > { %v505_v24 = vpack.c.bf16 %v504_v22, %v504_v22 }
 0x465   : > { %1058 = vmatmul.msk.bf16.vlgmr.msra.gmra.mxu3 %vm292_vm2, %v505_v24  ;;  %v744_v24 = vld [vmem:[#allocation7 + $0xa] sm:$0x3] }
 0x468   : > { %v502_v25 = vpop.f32.mrf.mxu2  ;;  %v549_v26 = vpop.f32.mrf.mxu0 }
 0x469   : > { %v749_v25 = vsel %vm352_vm4, %v744_v24, 0 }
 0x46a   : > { %758 = vmatpush.bf16.msra.mxu0 %v749_v25 }
 0x47b   : > { %609 = vrot.lane.b32.xlu1 %v1538_v5, %s1389_s19  ;;  %s939_s19 = sshll.u32 %s935_s29, 4  ;;  %s940_s19 = int_to_ptr.hbm [resolvable:$true] %s939_s19 }
 0x483   : > { %686 = vrot.lane.b32.xlu1 %v1538_v5, %s1390_s5  ;;  %s925_s5 = scalar_lea.sflag [#allocation4], %s1523_s20 }
 0x4d5   : > { %v553_v27 = vpop.xlane.xlu1 %552 }
 0x4d6   : > { %v554_v28 = vsub.f32 %v547_v21, %v553_v27 }
 0x4d8   : > { %v555_v29 = vmul.f32 1.442695, %v554_v28 }
 0x4da   : > { %1187 = vpow2.f32 %v555_v29 }
 0x4e0   : > { %v1188_v32 = vpop.eup %1187 }
 0x4e1   : > { %v561_v33 = vpack.c.bf16 %v1188_v32, %v1188_v32  ;;  %v557_v34 = vsel %vm312_vm3, %v1188_v32, 0.0 }
 0x4e2   : > { %558 = vadd.xlane.f32.xlu2 %v557_v34 }
 0x4e3   : > { %1060 = vmatmul.msk.bf16.vlgmr.msra.gmra.mxu1 %vm312_vm3, %v561_v33 }
 0x4e8   : > { %v523_v35 = vpop.f32.mrf.mxu3 }
 0x4e9   : > { %v527_v36 = vadd.f32 %v523_v35, %v448_v17 }
 0x4ed   : > { %v610_v38 = vpop.permute.xlu1 %609 }
 0x4ee   : > { %v615_v39 = vsel %vm292_vm2, %v610_v38, 0 }
 0x4ef   : > { %624 = vmatpush.bf16.xpose.msrb.mxu3 %v615_v39 }
 0x4f0   : > { %v525_v41 = vpop.f32.mrf.mxu3 }
 0x4f5   : > { %v687_v50 = vpop.permute.xlu1 %686 }
 0x4f6   : > { %1062 = vmatmul.msk.bf16.vlgmr.msrb.gmra.mxu3 %vm292_vm2, %v608_v9 }
 0x4f7   : > { %735 = vmatpush.bf16.msra.mxu3 %v726_v40 }
 0x4fa   : > { %688 = vrot.lane.b32.xlu2 %v1538_v5, %s1391_s6  ;;  %s1311_s6 = sshra.s32 %s940_s19, 4  ;;  %s1312_s6 = int_to_ptr.hbm [resolvable:$true] %s1311_s6 }
 0x4fb   : > { %p1318_p12 = scmp.lt.s32.totalorder %s1312_s6, %s1674_s4 }
 0x555   : > { %v559_v42 = vpop.xlane.xlu2 %558 }
 0x556   : > { %1189 = vrcp.f32 %v559_v42 }
 0x55c   : > { %v1190_v45 = vpop.eup %1189 }
 0x55d   : > { %v689_v43 = vpop.permute.xlu2 %688 }
 0x55e   : > { %v694_v44 = vsel %vm292_vm2, %v689_v43, 0 }
 0x55f   : > { %703 = vmatpush.bf16.xpose.msra.mxu2 %v694_v44 }
 0x560   : > { %v579_v46 = vpop.f32.mrf.mxu1 }
 0x561   : > { %v583_v47 = vmul.f32 %v1190_v45, %v579_v46 }
 0x563   : > { %v584_v48 = vpack.c.bf16 %v583_v47, %v583_v47 }
 0x565   : > { %1061 = vmatmul.msk.bf16.vlgmr.msrb.gmra.mxu2 %vm292_vm2, %v584_v48 }
 0x568   : > { %v581_v49 = vpop.f32.mrf.mxu1 }
 0x575   : > { %1065 = vmatmul.msk.bf16.vlgmr.msra.gmra.mxu2 %vm292_vm2, %v687_v50 }
 0x579   : > { %v626_v51 = vpop.f32.mrf.mxu3 }
 0x57a   : > { %v630_v52 = vsel %vm312_vm3, %v626_v51, -inf }
 0x57b   : > { %631 = vmax.xlane.f32.xlu2 %v630_v52  ;;  %v823_v52 = vld [vmem:[#allocation7 + $0xc] sm:$0x3] }
 0x581   : > { %v628_v53 = vpop.f32.mrf.mxu3 }
 0x582   : > { %v828_v53 = vsel %vm352_vm4, %v823_v52, 0 }
 0x583   : > { %837 = vmatpush.bf16.msrb.mxu3 %v828_v53 }
 0x5e8   : > { %v602_v54 = vpop.f32.mrf.mxu2 }
 0x5e9   : > { %v1600_v55 = vadd.f32 %v602_v54, %v527_v36  ;;  %v902_v54 = vld [vmem:[#allocation7 + $0xe] sm:$0x3] }
 0x5ee   : > { %v632_v56 = vpop.xlane.xlu2 %631 }
 0x5ef   : > { %v633_v57 = vsub.f32 %v626_v51, %v632_v56 }
 0x5f0   : > { %v604_v58 = vpop.f32.mrf.mxu2 }
 0x5f1   : > { %v634_v59 = vmul.f32 1.442695, %v633_v57 }
 0x5f3   : > { %1191 = vpow2.f32 %v634_v59 }
 0x5f8   : > { %v705_v60 = vpop.f32.mrf.mxu2 }
 0x5f9   : > { %v1192_v61 = vpop.eup %1191  ;;  %v709_v62 = vsel %vm312_vm3, %v705_v60, -inf }
 0x5fa   : > { %v640_v63 = vpack.c.bf16 %v1192_v61, %v1192_v61  ;;  %710 = vmax.xlane.f32.xlu1 %v709_v62  ;;  %v636_v0 = vsel %vm312_vm3, %v1192_v61, 0.0 }
 0x5fb   : > { %637 = vadd.xlane.f32.xlu0 %v636_v0 }
 0x5fc   : > { %1063 = vmatmul.msk.bf16.vlgmr.msrb.gmra.mxu0 %vm312_vm3, %v640_v63 }
 0x600   : > { %v707_v1 = vpop.f32.mrf.mxu2 }
 0x60f   : > { %765 = vrot.lane.b32.xlu0 %v1538_v5, %s1392_s7  ;;  %s1313_s7 = scalar_lea.hbm %s1312_s6, 8 }
 0x610   : > { %p1314_p1 = scmp.ne.s32.totalorder %s1312_s6, %s1313_s7  ;;  %p1319_p7 = scmp.lt.s32.totalorder %s1317_s28, %s1313_s7 }
 0x612   : > { %p1315_p3 = pnand %p1314_p1, %p1492_p4  ;;  %p1320_p8 = por %p1319_p7, %p1318_p12 }
 0x613   : > { %767 = vrot.lane.b32.xlu1 %v1538_v5, %s1393_s8 }
 0x614   : > { %p1316_p5 = pneg %p1315_p3 }
 0x616   : > { %p1321_p9 = pnand %p1320_p8, %p1316_p5 }
 0x617   : > { %799 = vrot.lane.b32.xlu0 %v1538_v5, %s1394_s9 }
 0x61b   : > { %844 = vrot.lane.b32.xlu1 %v1538_v5, %s1395_s11 }
 0x61f   : > { %878 = vrot.lane.b32.xlu0 %v1538_v5, %s1396_s12 }
 0x66d   : > { %v711_v4 = vpop.xlane.xlu1 %710 }
 0x66e   : > { %v712_v6 = vsub.f32 %v705_v60, %v711_v4  ;;  %v638_v8 = vpop.xlane.xlu0 %637 }
 0x670   : > { %v713_v7 = vmul.f32 1.442695, %v712_v6 }
 0x672   : > { %1193 = vpow2.f32 %v713_v7 }
 0x673   : > { %1195 = vrcp.f32 %v638_v8 }
 0x678   : > { %v1194_v9 = vpop.eup %1193 }
 0x679   : > { %v1196_v10 = vpop.eup %1195  ;;  %v719_v11 = vpack.c.bf16 %v1194_v9, %v1194_v9  ;;  %v658_v12 = vpop.f32.mrf.mxu0  ;;  %v715_v13 = vsel %vm312_vm3, %v1194_v9, 0.0 }
 0x67a   : > { %v662_v14 = vmul.f32 %v1196_v10, %v658_v12  ;;  %716 = vadd.xlane.f32.xlu2 %v715_v13 }
 0x67b   : > { %1066 = vmatmul.msk.bf16.vlgmr.msra.gmra.mxu3 %vm312_vm3, %v719_v11 }
 0x67c   : > { %v663_v15 = vpack.c.bf16 %v662_v14, %v662_v14 }
 0x67e   : > { %1064 = vmatmul.msk.bf16.vlgmr.msrb.gmra.mxu1 %vm292_vm2, %v663_v15 }
 0x681   : > { %v766_v16 = vpop.permute.xlu0 %765  ;;  %v660_v17 = vpop.f32.mrf.mxu0 }
 0x685   : > { %v768_v18 = vpop.permute.xlu1 %767 }
 0x686   : > { %v773_v19 = vsel %vm292_vm2, %v768_v18, 0 }
 0x687   : > { %782 = vmatpush.bf16.xpose.msra.mxu1 %v773_v19 }
 0x689   : > { %v800_v20 = vpop.permute.xlu0 %799 }
 0x68a   : > { %v805_v21 = vsel %vm329_vm1, %v800_v20, 0 }
 0x68b   : > { %814 = vmatpush.bf16.msrb.mxu2 %v805_v21 }
 0x68d   : > { %v845_v38 = vpop.permute.xlu1 %844 }
 0x68e   : > { %1068 = vmatmul.msk.bf16.vlgmr.msra.gmra.mxu1 %vm292_vm2, %v766_v16 }
 0x691   : > { %v879_v22 = vpop.permute.xlu0 %878 }
 0x692   : > { %v884_v23 = vsel %vm329_vm1, %v879_v22, 0  ;;  %846 = vrot.lane.b32.xlu2 %v1538_v5, %s1397_s25 }
 0x693   : > { %893 = vmatpush.bf16.msrb.mxu1 %v884_v23 }
 0x6ed   : > { %v717_v26 = vpop.xlane.xlu2 %716 }
 0x6ee   : > { %1197 = vrcp.f32 %v717_v26 }
 0x6f4   : > { %v1198_v31 = vpop.eup %1197 }
 0x6f5   : > { %v847_v27 = vpop.permute.xlu2 %846 }
 0x6f6   : > { %v852_v28 = vsel %vm292_vm2, %v847_v27, 0 }
 0x6f7   : > { %861 = vmatpush.bf16.xpose.msrb.mxu0 %v852_v28 }
 0x6fb   : > { %v681_v29 = vpop.f32.mrf.mxu1 }
 0x6fc   : > { %v685_v30 = vadd.f32 %v681_v29, %v1600_v55  ;;  %v907_v55 = vsel %vm352_vm4, %v902_v54, 0 }
 0x6fd   : > { %916 = vmatpush.bf16.msra.mxu2 %v907_v55 }
 0x6fe   : > { %v737_v32 = vpop.f32.mrf.mxu3 }
 0x6ff   : > { %v741_v33 = vmul.f32 %v1198_v31, %v737_v32 }
 0x701   : > { %v742_v34 = vpack.c.bf16 %v741_v33, %v741_v33 }
 0x703   : > { %v683_v35 = vpop.f32.mrf.mxu1  ;;  %1067 = vmatmul.msk.bf16.vlgmr.msra.gmra.mxu0 %vm292_vm2, %v742_v34 }
 0x706   : > { %v739_v5 = vpop.f32.mrf.mxu3 }
 0x70b   : > { %v784_v36 = vpop.f32.mrf.mxu1 }
 0x70c   : > { %v788_v37 = vsel %vm312_vm3, %v784_v36, -inf }
 0x70d   : > { %789 = vmax.xlane.f32.xlu2 %v788_v37 }
 0x713   : > { %v786_v39 = vpop.f32.mrf.mxu1  ;;  %1071 = vmatmul.msk.bf16.vlgmr.msrb.gmra.mxu0 %vm292_vm2, %v845_v38 }
 0x780   : > { %v790_v40 = vpop.xlane.xlu2 %789  ;;  %v760_v41 = vpop.f32.mrf.mxu0 }
 0x781   : > { %v791_v42 = vsub.f32 %v784_v36, %v790_v40  ;;  %v764_v43 = vadd.f32 %v760_v41, %v685_v30 }
 0x783   : > { %v792_v44 = vmul.f32 1.442695, %v791_v42 }
 0x785   : > { %1199 = vpow2.f32 %v792_v44 }
 0x788   : > { %v762_v45 = vpop.f32.mrf.mxu0 }
 0x78b   : > { %v1200_v46 = vpop.eup %1199 }
 0x78c   : > { %v798_v47 = vpack.c.bf16 %v1200_v46, %v1200_v46  ;;  %v794_v48 = vsel %vm312_vm3, %v1200_v46, 0.0 }
 0x78d   : > { %795 = vadd.xlane.f32.xlu0 %v794_v48 }
 0x78e   : > { %1069 = vmatmul.msk.bf16.vlgmr.msrb.gmra.mxu2 %vm312_vm3, %v798_v47 }
 0x790   : > { %v863_v49 = vpop.f32.mrf.mxu0 }
 0x791   : > { %v867_v50 = vsel %vm312_vm3, %v863_v49, -inf }
 0x792   : > { %868 = vmax.xlane.f32.xlu1 %v867_v50 }
 0x798   : > { %v865_v51 = vpop.f32.mrf.mxu0 }
 0x800   : > { %v796_v58 = vpop.xlane.xlu0 %795 }
 0x805   : > { %v869_v56 = vpop.xlane.xlu1 %868 }
 0x806   : > { %v870_v57 = vsub.f32 %v863_v49, %v869_v56 }
 0x808   : > { %v871_v59 = vmul.f32 1.442695, %v870_v57 }
 0x80a   : > { %1201 = vpow2.f32 %v871_v59 }
 0x80b   : > { %1203 = vrcp.f32 %v796_v58 }
 0x810   : > { %v1202_v60 = vpop.eup %1201 }
 0x811   : > { %v1204_v61 = vpop.eup %1203  ;;  %v877_v62 = vpack.c.bf16 %v1202_v60, %v1202_v60  ;;  %v816_v63 = vpop.f32.mrf.mxu2  ;;  %v873_v0 = vsel %vm312_vm3, %v1202_v60, 0.0 }
 0x812   : > { %v820_v1 = vmul.f32 %v1204_v61, %v816_v63  ;;  %874 = vadd.xlane.f32.xlu2 %v873_v0 }
 0x813   : > { %1072 = vmatmul.msk.bf16.vlgmr.msrb.gmra.mxu1 %vm312_vm3, %v877_v62 }
 0x814   : > { %v821_v2 = vpack.c.bf16 %v820_v1, %v820_v1 }
 0x816   : > { %1070 = vmatmul.msk.bf16.vlgmr.msrb.gmra.mxu3 %vm292_vm2, %v821_v2 }
 0x819   : > { %v818_v3 = vpop.f32.mrf.mxu2 }
 0x885   : > { %v875_v4 = vpop.xlane.xlu2 %874 }
 0x886   : > { %1205 = vrcp.f32 %v875_v4 }
 0x88c   : > { %v1206_v6 = vpop.eup %1205 }
 0x890   : > { %v895_v7 = vpop.f32.mrf.mxu1 }
 0x891   : > { %v899_v8 = vmul.f32 %v1206_v6, %v895_v7 }
 0x893   : > { %v900_v9 = vpack.c.bf16 %v899_v8, %v899_v8 }
 0x895   : > { %1073 = vmatmul.msk.bf16.vlgmr.msra.gmra.mxu2 %vm292_vm2, %v900_v9 }
 0x898   : > { %v897_v10 = vpop.f32.mrf.mxu1 }
 0x899   : > { %v839_v11 = vpop.f32.mrf.mxu3 }
 0x89a   : > { %v843_v12 = vadd.f32 %v839_v11, %v764_v43 }
 0x8a1   : > { %v841_v13 = vpop.f32.mrf.mxu3 }
 0x918   : > { %v918_v14 = vpop.f32.mrf.mxu2 }
 0x919   : > { %v922_v15 = vadd.f32 %v918_v14, %v843_v12 }
 0x91b   : > { %923 = vst.msk [vmem:[%s247_s30] sm:$0xff] %vm267_vm0, %v922_v15 }
 0x91c   : > { %1324 = shalt.err (!%p1321_p9)
}
 0x91d   : > { %1090 = dma.vmem_to_hbm [thread:$0]  (%p1492_p4), %s938_s23, 128, %s940_s19, %s925_s5  }
 0x920   : > { %v920_v16 = vpop.f32.mrf.mxu2 }
 0x921 PF: > { %s951_s20 = sand.u32 1, %s1355_s15   ;;  %p1681_p10 = scmp.ge.s32.totalorder %s1367_s18, 2 }
 0x922   : > { %s952_s12 = scalar_lea.sflag [#allocation4], %s951_s20 }
 0x923   : > { %p1104_p13 = pnand %p1681_p10, %p1496_p6 }
 0x925   : > { %p1105_p11 = pneg %p1104_p13 }
 0x927   : > { %1350 = dma.done.wait (%p1105_p11), %s952_s12, 128  }
 0x928   : > { %1352 = vsyncadd (%p1105_p11), %s952_s12, 4294967168  ;;  %p18_p0 = scmp.ge.s32.totalorder %s1466_s10, 4   ;;  %s1682_s15 = smov %s1359_s16 }
 0x929   : > { %s1683_s16 = smov %s1363_s17  ;;  %s1684_s17 = smov %s1477_s13 }
 0x92a   : > { %s1685_s18 = smov %s1466_s10  ;;  %20 = sbr.rel (!%p18_p0) target bundleno = 6 (0x6), region = 96 }
 0x92f   :  { %958 = vsyncpa [#allocation3], 1 }
 0x930   :  { %960 = vsyncpa [#allocation3 + $0x1], 1 }
 0x931   :  { %961 = vsyncpa [#allocation6], 1 }
 0x932   :  { %962 = vsyncpa [#allocation4], 1 }
 0x933   :  { %964 = vsyncpa [#allocation4 + $0x1], 1 }

</bundles_post_ra>
